<compile_context>
chip_gen: v5e
topology: v5e:2x2
jax: 0.10.0
libtpu: 0.0.40
codegen_flags: <defaults>
</compile_context>

<pallas_src>
import functools
import math

import jax
import jax.numpy as jnp
from jax import lax
from jax.experimental import pallas as pl
from jax.experimental.pallas import tpu as pltpu

INPUT_SIZE = 20      # len(np.linspace(0, 10, 20))
HIDDEN_SIZE = 64
OUTPUT_SIZE = 4
_LANE = 128          # TPU lane width
_SUB = 256           # in-kernel sub-tile (lanes) so h stays in vregs


def _round_up(n, m):
    return ((n + m - 1) // m) * m


def _mlp_kernel(x_ref, w1t_ref, b1_ref, w2t_ref, b2_ref, o_ref, *,
                sub, bf16_matmul):
    # x_ref:   [TB, IN]   (native row-major x tile)
    # w1t_ref: [HID, IN], b1_ref: [HID, 1]
    # w2t_ref: [OUT, HID], b2_ref: [OUT, 1]
    # o_ref:   [OUT, TB]  (lane-dense output, batch on lanes)
    w1t = w1t_ref[...]
    b1 = b1_ref[...]
    w2t = w2t_ref[...]
    b2 = b2_ref[...]
    if bf16_matmul:
        w1t = w1t.astype(jnp.bfloat16)
        w2t = w2t.astype(jnp.bfloat16)

    n_sub = o_ref.shape[1] // sub  # static

    def body(j, carry):
        off = pl.multiple_of(j * sub, sub)
        x = x_ref[pl.ds(off, sub), :]                     # [sub, IN]
        if bf16_matmul:
            x = x.astype(jnp.bfloat16)
        # NT contraction: [HID, IN] x [sub, IN] -> [HID, sub]
        # (the x-tile transpose goes to the otherwise-idle XLU slot)
        h = lax.dot_general(w1t, x, (((1,), (1,)), ((), ())),
                            preferred_element_type=jnp.float32)
        h = jnp.maximum(h + b1, 0.0)                      # [HID, sub]
        if bf16_matmul:
            h = h.astype(jnp.bfloat16)
        out = jnp.dot(w2t, h, preferred_element_type=jnp.float32)  # [OUT, sub]
        o_ref[:, pl.ds(off, sub)] = (out + b2).astype(o_ref.dtype)
        return carry

    lax.fori_loop(0, n_sub, body, 0, unroll=True)


@functools.partial(jax.jit, static_argnames=("tb", "bf16_matmul"))
def mlp_forward(x, w1, b1, w2, b2, *, tb=8192, bf16_matmul=False):
    """x: [B, INPUT_SIZE] f32, w1: [IN, HID], b1: [1, HID], w2: [HID, OUT],
    b2: [1, OUT]  ->  [B, OUTPUT_SIZE] f32 (same semantics as Net.forward)."""
    B = x.shape[0]

    # Weights / biases: tiny, transposed once for the lane-dense orientation.
    w1t = w1.T                              # [HID, IN]
    w2t = w2.T                              # [OUT, HID]
    b1c = b1.reshape(HIDDEN_SIZE, 1)        # [HID, 1]
    b2c = b2.reshape(OUTPUT_SIZE, 1)        # [OUT, 1]

    # Pad batch only to the lane width (no-op when B % 128 == 0).
    b_pad = _round_up(B, _LANE)
    if b_pad != B:
        x = jnp.pad(x, ((0, b_pad - B), (0, 0)))

    # Batch-tile selection.
    tb = max(_LANE, (tb // _LANE) * _LANE)          # guard: multiple of 128
    tb_eff = min(tb, b_pad)
    # v7x: make sure the grid has >= 2 steps so both TensorCores get work.
    if tb_eff >= b_pad and b_pad > _LANE:
        tb_eff = _round_up(pl.cdiv(b_pad, 2), _LANE)
    # Keep the tile divisible by the in-kernel sub-tile.
    if tb_eff >= _SUB:
        tb_eff = (tb_eff // _SUB) * _SUB
        sub = _SUB
    else:
        sub = tb_eff

    grid = (pl.cdiv(b_pad, tb_eff),)
    kernel = functools.partial(_mlp_kernel, sub=sub, bf16_matmul=bf16_matmul)

    out_t = pl.pallas_call(
        kernel,
        out_shape=jax.ShapeDtypeStruct((OUTPUT_SIZE, b_pad), jnp.float32),
        grid=grid,
        in_specs=[
            # streamed x tile in native layout (double-buffered by Pallas)
            pl.BlockSpec((tb_eff, INPUT_SIZE), lambda i: (i, 0)),
            # weights / biases: constant index_map -> resident in VMEM
            pl.BlockSpec((HIDDEN_SIZE, INPUT_SIZE), lambda i: (0, 0)),
            pl.BlockSpec((HIDDEN_SIZE, 1), lambda i: (0, 0)),
            pl.BlockSpec((OUTPUT_SIZE, HIDDEN_SIZE), lambda i: (0, 0)),
            pl.BlockSpec((OUTPUT_SIZE, 1), lambda i: (0, 0)),
        ],
        out_specs=pl.BlockSpec((OUTPUT_SIZE, tb_eff), lambda i: (0, i)),
        compiler_params=pltpu.CompilerParams(
            dimension_semantics=("parallel",),
            vmem_limit_bytes=32 * 1024 * 1024),
    )(x, w1t, b1c, w2t, b2c)

    # Back to the PyTorch layout [B, OUTPUT_SIZE]; drop lane padding.
    return out_t[:, :B].T


def init_params(key):
    """Deterministic init matching nn.Linear's default U(-1/sqrt(fan_in), +)."""
    k1, k2, k3, k4 = jax.random.split(key, 4)
    bound1 = 1.0 / math.sqrt(INPUT_SIZE)
    bound2 = 1.0 / math.sqrt(HIDDEN_SIZE)
    # Stored as [in, out] (transposed vs. PyTorch's [out, in]) for x @ W.
    w1 = jax.random.uniform(k1, (INPUT_SIZE, HIDDEN_SIZE), jnp.float32,
                            minval=-bound1, maxval=bound1)
    b1 = jax.random.uniform(k2, (1, HIDDEN_SIZE), jnp.float32,
                            minval=-bound1, maxval=bound1)
    w2 = jax.random.uniform(k3, (HIDDEN_SIZE, OUTPUT_SIZE), jnp.float32,
                            minval=-bound2, maxval=bound2)
    b2 = jax.random.uniform(k4, (1, OUTPUT_SIZE), jnp.float32,
                            minval=-bound2, maxval=bound2)
    return w1, b1, w2, b2


if __name__ == "__main__":
    key = jax.random.PRNGKey(0)
    kx, kp = jax.random.split(key)
    w1, b1, w2, b2 = init_params(kp)

    # Configs exercise: tiny batch (single step), non-multiple-of-128 batch
    # with a partial last block, multi-step grid with small tile, and the
    # v7x 2-step split path at the default tile size.
    for batch, tbv in ((8, 8192), (300, 8192), (2048, 512), (4096, 8192)):
        x = jax.random.normal(jax.random.fold_in(kx, batch),
                              (batch, INPUT_SIZE), jnp.float32)
        out = jax.block_until_ready(mlp_forward(x, w1, b1, w2, b2, tb=tbv))

        # Pure-JAX reference check.
        ref = jnp.maximum(x @ w1 + b1, 0.0) @ w2 + b2
        assert out.shape == (batch, OUTPUT_SIZE)
        assert jnp.allclose(out, ref, atol=1e-5, rtol=1e-5), (
            f"mismatch at batch={batch}, tb={tbv}")

    print("KERNEL_OK")
</pallas_src>

<mosaic_0001>
module attributes {stable_mosaic.version = 11 : i64} {
  func.func @_mlp_kernel(%arg0: i32, %arg1: memref<128x20xf32, #tpu.memory_space<vmem>>, %arg2: memref<64x20xf32, #tpu.memory_space<vmem>>, %arg3: memref<64x1xf32, #tpu.memory_space<vmem>>, %arg4: memref<4x64xf32, #tpu.memory_space<vmem>>, %arg5: memref<4x1xf32, #tpu.memory_space<vmem>>, %arg6: memref<4x128xf32, #tpu.memory_space<vmem>>) attributes {dimension_semantics = [#tpu.dimension_semantics<parallel>], iteration_bounds = array<i64: 1>, scalar_prefetch = 0 : i64, scratch_operands = 0 : i64, tpu.core_type = #tpu.core_type<tc>, window_params = [{transform_indices = @transform_0, window_bounds = array<i64: 128, 20>}, {pipeline_mode = #tpu.pipeline_mode<synchronous>, transform_indices = @transform_1, window_bounds = array<i64: 64, 20>}, {pipeline_mode = #tpu.pipeline_mode<synchronous>, transform_indices = @transform_2, window_bounds = array<i64: 64, 1>}, {pipeline_mode = #tpu.pipeline_mode<synchronous>, transform_indices = @transform_3, window_bounds = array<i64: 4, 64>}, {pipeline_mode = #tpu.pipeline_mode<synchronous>, transform_indices = @transform_4, window_bounds = array<i64: 4, 1>}, {transform_indices = @transform_5, window_bounds = array<i64: 4, 128>}]} {
    %c0 = arith.constant 0 : index
    %c0_0 = arith.constant 0 : index
    %0 = vector.load %arg2[%c0, %c0_0] : memref<64x20xf32, #tpu.memory_space<vmem>>, vector<64x20xf32>
    %c0_1 = arith.constant 0 : index
    %c0_2 = arith.constant 0 : index
    %1 = vector.load %arg3[%c0_1, %c0_2] : memref<64x1xf32, #tpu.memory_space<vmem>>, vector<64x1xf32>
    %c0_3 = arith.constant 0 : index
    %c0_4 = arith.constant 0 : index
    %2 = vector.load %arg4[%c0_3, %c0_4] : memref<4x64xf32, #tpu.memory_space<vmem>>, vector<4x64xf32>
    %c0_5 = arith.constant 0 : index
    %c0_6 = arith.constant 0 : index
    %3 = vector.load %arg5[%c0_5, %c0_6] : memref<4x1xf32, #tpu.memory_space<vmem>>, vector<4x1xf32>
    %c0_i32 = arith.constant 0 : i32
    %c128_i32 = arith.constant 128 : i32
    %4 = arith.muli %c0_i32, %c128_i32 : i32
    %5 = tpu.assume_multiple %4, 128 : i32
    %6 = arith.index_cast %5 : i32 to index
    %c0_7 = arith.constant 0 : index
    %7 = vector.load %arg1[%6, %c0_7] : memref<128x20xf32, #tpu.memory_space<vmem>>, vector<128x20xf32>
    %cst = arith.constant dense<0.000000e+00> : vector<64x128xf32>
    %8 = tpu.matmul %0, %7, %cst {dimension_numbers = #tpu.dot_dimension_numbers<[1], [1], [0], [0], [0, 0, 1, 0], [], []>} : vector<64x20xf32>, vector<128x20xf32>, vector<64x128xf32> -> vector<64x128xf32>
    %9 = vector.broadcast %1 : vector<64x1xf32> to vector<64x128xf32>
    %10 = arith.addf %8, %9 : vector<64x128xf32>
    %cst_8 = arith.constant 0.000000e+00 : f32
    %11 = vector.broadcast %cst_8 : f32 to vector<64x128xf32>
    %12 = arith.maximumf %10, %11 : vector<64x128xf32>
    %cst_9 = arith.constant dense<0.000000e+00> : vector<4x128xf32>
    %13 = tpu.matmul %2, %12, %cst_9 {dimension_numbers = #tpu.dot_dimension_numbers<[1], [0], [0], [1], [0, 0, 1, 1], [], []>} : vector<4x64xf32>, vector<64x128xf32>, vector<4x128xf32> -> vector<4x128xf32>
    %14 = vector.broadcast %3 : vector<4x1xf32> to vector<4x128xf32>
    %15 = arith.addf %13, %14 : vector<4x128xf32>
    %c0_10 = arith.constant 0 : index
    %16 = arith.index_cast %5 : i32 to index
    %17 = vector.load %arg6[%c0_10, %16] : memref<4x128xf32, #tpu.memory_space<vmem>>, vector<4x128xf32>
    tpu.vector_store %arg6[%c0_10, %16], %15 {strides = array<i32>} : memref<4x128xf32, #tpu.memory_space<vmem>>, vector<4x128xf32>,
    %c1_i32 = arith.constant 1 : i32
    return
  }
  func.func @transform_0(%arg0: i32) -> (i32, i32) {
    %c0_i32 = arith.constant 0 : i32
    %c0_i32_0 = arith.constant 0 : i32
    return %arg0, %c0_i32 : i32, i32
  }
  func.func @transform_1(%arg0: i32) -> (i32, i32) {
    %c0_i32 = arith.constant 0 : i32
    %c0_i32_0 = arith.constant 0 : i32
    %c0_i32_1 = arith.constant 0 : i32
    return %c0_i32, %c0_i32_0 : i32, i32
  }
  func.func @transform_2(%arg0: i32) -> (i32, i32) {
    %c0_i32 = arith.constant 0 : i32
    %c0_i32_0 = arith.constant 0 : i32
    %c0_i32_1 = arith.constant 0 : i32
    return %c0_i32, %c0_i32_0 : i32, i32
  }
  func.func @transform_3(%arg0: i32) -> (i32, i32) {
    %c0_i32 = arith.constant 0 : i32
    %c0_i32_0 = arith.constant 0 : i32
    %c0_i32_1 = arith.constant 0 : i32
    return %c0_i32, %c0_i32_0 : i32, i32
  }
  func.func @transform_4(%arg0: i32) -> (i32, i32) {
    %c0_i32 = arith.constant 0 : i32
    %c0_i32_0 = arith.constant 0 : i32
    %c0_i32_1 = arith.constant 0 : i32
    return %c0_i32, %c0_i32_0 : i32, i32
  }
  func.func @transform_5(%arg0: i32) -> (i32, i32) {
    %c0_i32 = arith.constant 0 : i32
    %c0_i32_0 = arith.constant 0 : i32
    return %c0_i32, %arg0 : i32, i32
  }
}

</mosaic_0001>

<bundles_post_ra>
// kernel: mlp_forward.1
= control target key start
LH: loop header
LB: loop body
LE: loop exit
PB: predicated region body
PF: predicated region fallthrough
CT: control target
= control target key end

     0   :  { %vm94_vm0 = vcmask 162816   ;;  %v327_v14 = vmov 0   ;;  %vm221_vm1 = vcmask 523264   ;;  %s535_s0 = inlined_call_operand.vmem [shape: f32[128,20], index: 0, kind: input, shape index: {}]   ;;  %s536_s2 = inlined_call_operand.vmem [shape: f32[64,1], index: 2, kind: input, shape index: {}]   ;;  %s537_s1 = inlined_call_operand.vmem [shape: f32[64,20], index: 1, kind: input, shape index: {}]   ;;  %s538_s4 = inlined_call_operand.vmem [shape: f32[4,1], index: 4, kind: input, shape index: {}]   ;;  %s539_s3 = inlined_call_operand.vmem [shape: f32[4,64], index: 3, kind: input, shape index: {}]   ;;  %s540_s5 = inlined_call_operand.vmem [shape: f32[4,128], index: 5, kind: output, shape index: {}]  }
   0x1   :  { %v53_v0 = vld [vmem:[%s535_s0 + $0x78] sm:$0xff]  ;;  %v52_v1 = vld [vmem:[%s535_s0 + $0x70] sm:$0xff]  ;;  %v51_v2 = vld [vmem:[%s535_s0 + $0x68] sm:$0xff]  ;;  %324 = vset.pattern.permute.xlu0 %v327_v14  ;;  %325 = vset.pattern.permute.xlu1 %v327_v14 }
   0x2   :  { %277 = vmatpush.xpose.msk.msra.mxu3 %vm94_vm0, %v53_v0  ;;  %250 = vmatpush.xpose.msk.msra.mxu0 %vm94_vm0, %v53_v0  ;;  %v50_v3 = vld [vmem:[%s535_s0 + $0x60] sm:$0xff]  ;;  %v49_v4 = vld [vmem:[%s535_s0 + $0x58] sm:$0xff]  ;;  %v48_v5 = vld [vmem:[%s535_s0 + $0x50] sm:$0xff] }
   0x3   :  { %276 = vmatpush.xpose.msk.msra.mxu2 %vm94_vm0, %v53_v0  ;;  %275 = vmatpush.xpose.msk.msra.mxu1 %vm94_vm0, %v53_v0  ;;  %v47_v6 = vld [vmem:[%s535_s0 + $0x48] sm:$0xff]  ;;  %v46_v7 = vld [vmem:[%s535_s0 + $0x40] sm:$0xff]  ;;  %v45_v8 = vld [vmem:[%s535_s0 + $0x38] sm:$0xff] }
   0x4   :  { %v44_v9 = vld [vmem:[%s535_s0 + $0x30] sm:$0xff]  ;;  %v43_v10 = vld [vmem:[%s535_s0 + $0x28] sm:$0xff]  ;;  %v35_v11 = vld [vmem:[%s536_s2 + $0x38] sm:$0xff]  ;;  %326 = vset.pattern.permute.xlu2 %v327_v14 }
   0x5   :  { %v33_v12 = vld [vmem:[%s536_s2 + $0x28] sm:$0xff]  ;;  %v42_v13 = vld [vmem:[%s535_s0 + $0x20] sm:$0xff]  ;;  %91 = vperm.xlu0 %324, %v35_v11   ;;  %v41_v15 = vld [vmem:[%s535_s0 + $0x18] sm:$0xff] }
   0x6   :  { %280 = vmatpush.xpose.msk.msra.mxu3 %vm94_vm0, %v52_v1  ;;  %251 = vmatpush.xpose.msk.msra.mxu0 %vm94_vm0, %v52_v1  ;;  %v34_v16 = vld [vmem:[%s536_s2 + $0x30] sm:$0xff]  ;;  %v32_v17 = vld [vmem:[%s536_s2 + $0x20] sm:$0xff]  ;;  %v31_v18 = vld [vmem:[%s536_s2 + $0x18] sm:$0xff] }
   0x7   :  { %279 = vmatpush.xpose.msk.msra.mxu2 %vm94_vm0, %v52_v1  ;;  %278 = vmatpush.xpose.msk.msra.mxu1 %vm94_vm0, %v52_v1  ;;  %v40_v19 = vld [vmem:[%s535_s0 + $0x10] sm:$0xff]  ;;  %v39_v20 = vld [vmem:[%s535_s0 + $0x8] sm:$0xff]  ;;  %v28_v23 = vld [vmem:[%s536_s2] sm:$0xff] }
   0x8   :  { %81 = vperm.xlu1 %325, %v33_v12   ;;  %71 = vperm.xlu2 %326, %v31_v18   ;;  %v30_v21 = vld [vmem:[%s536_s2 + $0x10] sm:$0xff]  ;;  %v29_v22 = vld [vmem:[%s536_s2 + $0x8] sm:$0xff]  ;;  %v38_v24 = vld [vmem:[%s535_s0] sm:$0xff] }
   0x9   :  { %v25_v25 = vld [vmem:[%s537_s1 + $0x28] sm:$0xff]  ;;  %v20_v26 = vld [vmem:[%s537_s1] sm:$0xff]  ;;  %v22_v28 = vld [vmem:[%s537_s1 + $0x10] sm:$0xff] }
   0xa   :  { %283 = vmatpush.xpose.msk.msra.mxu3 %vm94_vm0, %v51_v2  ;;  %252 = vmatpush.xpose.msk.msra.mxu0 %vm94_vm0, %v51_v2  ;;  %v24_v27 = vld [vmem:[%s537_s1 + $0x20] sm:$0xff]  ;;  %v26_v30 = vld [vmem:[%s537_s1 + $0x30] sm:$0xff]  ;;  %v21_v31 = vld [vmem:[%s537_s1 + $0x8] sm:$0xff] }
   0xb   :  { %282 = vmatpush.xpose.msk.msra.mxu2 %vm94_vm0, %v51_v2  ;;  %281 = vmatpush.xpose.msk.msra.mxu1 %vm94_vm0, %v51_v2  ;;  %v37_v29 = vld [vmem:[%s538_s4] sm:$0xf]  ;;  %v23_v32 = vld [vmem:[%s537_s1 + $0x18] sm:$0xff] }
   0xc   :  { %v27_v33 = vld [vmem:[%s537_s1 + $0x38] sm:$0xff]  ;;  %v36_v2 = vld [vmem:[%s539_s3] sm:$0xf] }
   0xd   :  { %86 = vperm.xlu0 %324, %v34_v16  }
   0xe   :  { %286 = vmatpush.xpose.msk.msra.mxu3 %vm94_vm0, %v50_v3  ;;  %253 = vmatpush.xpose.msk.msra.mxu0 %vm94_vm0, %v50_v3 }
   0xf   :  { %285 = vmatpush.xpose.msk.msra.mxu2 %vm94_vm0, %v50_v3  ;;  %284 = vmatpush.xpose.msk.msra.mxu1 %vm94_vm0, %v50_v3 }
  0x10   :  { %76 = vperm.xlu1 %325, %v32_v17   ;;  %66 = vperm.xlu2 %326, %v30_v21  }
  0x12   :  { %289 = vmatpush.xpose.msk.msra.mxu3 %vm94_vm0, %v49_v4  ;;  %254 = vmatpush.xpose.msk.msra.mxu0 %vm94_vm0, %v49_v4 }
  0x13   :  { %288 = vmatpush.xpose.msk.msra.mxu2 %vm94_vm0, %v49_v4  ;;  %287 = vmatpush.xpose.msk.msra.mxu1 %vm94_vm0, %v49_v4 }
  0x15   :  { %61 = vperm.xlu0 %324, %v29_v22  }
  0x16   :  { %292 = vmatpush.xpose.msk.msra.mxu3 %vm94_vm0, %v48_v5  ;;  %255 = vmatpush.xpose.msk.msra.mxu0 %vm94_vm0, %v48_v5 }
  0x17   :  { %291 = vmatpush.xpose.msk.msra.mxu2 %vm94_vm0, %v48_v5  ;;  %290 = vmatpush.xpose.msk.msra.mxu1 %vm94_vm0, %v48_v5 }
  0x18   :  { %56 = vperm.xlu1 %325, %v28_v23   ;;  %218 = vperm.xlu2 %326, %v37_v29  }
  0x1a   :  { %295 = vmatpush.xpose.msk.msra.mxu3 %vm94_vm0, %v47_v6  ;;  %256 = vmatpush.xpose.msk.msra.mxu0 %vm94_vm0, %v47_v6 }
  0x1b   :  { %294 = vmatpush.xpose.msk.msra.mxu2 %vm94_vm0, %v47_v6  ;;  %293 = vmatpush.xpose.msk.msra.mxu1 %vm94_vm0, %v47_v6 }
  0x1e   :  { %298 = vmatpush.xpose.msk.msra.mxu3 %vm94_vm0, %v46_v7  ;;  %257 = vmatpush.xpose.msk.msra.mxu0 %vm94_vm0, %v46_v7 }
  0x1f   :  { %297 = vmatpush.xpose.msk.msra.mxu2 %vm94_vm0, %v46_v7  ;;  %296 = vmatpush.xpose.msk.msra.mxu1 %vm94_vm0, %v46_v7 }
  0x22   :  { %301 = vmatpush.xpose.msk.msra.mxu3 %vm94_vm0, %v45_v8  ;;  %258 = vmatpush.xpose.msk.msra.mxu0 %vm94_vm0, %v45_v8 }
  0x23   :  { %300 = vmatpush.xpose.msk.msra.mxu2 %vm94_vm0, %v45_v8  ;;  %299 = vmatpush.xpose.msk.msra.mxu1 %vm94_vm0, %v45_v8 }
  0x26   :  { %304 = vmatpush.xpose.msk.msra.mxu3 %vm94_vm0, %v44_v9  ;;  %259 = vmatpush.xpose.msk.msra.mxu0 %vm94_vm0, %v44_v9 }
  0x27   :  { %303 = vmatpush.xpose.msk.msra.mxu2 %vm94_vm0, %v44_v9  ;;  %302 = vmatpush.xpose.msk.msra.mxu1 %vm94_vm0, %v44_v9 }
  0x2a   :  { %307 = vmatpush.xpose.msk.msra.mxu3 %vm94_vm0, %v43_v10  ;;  %260 = vmatpush.xpose.msk.msra.mxu0 %vm94_vm0, %v43_v10 }
  0x2b   :  { %306 = vmatpush.xpose.msk.msra.mxu2 %vm94_vm0, %v43_v10  ;;  %305 = vmatpush.xpose.msk.msra.mxu1 %vm94_vm0, %v43_v10 }
  0x2e   :  { %310 = vmatpush.xpose.msk.msra.mxu3 %vm94_vm0, %v42_v13  ;;  %261 = vmatpush.xpose.msk.msra.mxu0 %vm94_vm0, %v42_v13 }
  0x2f   :  { %309 = vmatpush.xpose.msk.msra.mxu2 %vm94_vm0, %v42_v13  ;;  %308 = vmatpush.xpose.msk.msra.mxu1 %vm94_vm0, %v42_v13 }
  0x32   :  { %313 = vmatpush.xpose.msk.msra.mxu3 %vm94_vm0, %v41_v15  ;;  %262 = vmatpush.xpose.msk.msra.mxu0 %vm94_vm0, %v41_v15 }
  0x33   :  { %312 = vmatpush.xpose.msk.msra.mxu2 %vm94_vm0, %v41_v15  ;;  %311 = vmatpush.xpose.msk.msra.mxu1 %vm94_vm0, %v41_v15 }
  0x36   :  { %316 = vmatpush.xpose.msk.msra.mxu3 %vm94_vm0, %v40_v19  ;;  %263 = vmatpush.xpose.msk.msra.mxu0 %vm94_vm0, %v40_v19 }
  0x37   :  { %315 = vmatpush.xpose.msk.msra.mxu2 %vm94_vm0, %v40_v19  ;;  %314 = vmatpush.xpose.msk.msra.mxu1 %vm94_vm0, %v40_v19 }
  0x3a   :  { %319 = vmatpush.xpose.msk.msra.mxu3 %vm94_vm0, %v39_v20  ;;  %264 = vmatpush.xpose.msk.msra.mxu0 %vm94_vm0, %v39_v20 }
  0x3b   :  { %318 = vmatpush.xpose.msk.msra.mxu2 %vm94_vm0, %v39_v20  ;;  %317 = vmatpush.xpose.msk.msra.mxu1 %vm94_vm0, %v39_v20 }
  0x3e   :  { %322 = vmatpush.xpose.msk.msra.mxu3 %vm94_vm0, %v38_v24  ;;  %265 = vmatpush.xpose.msk.msra.mxu0 %vm94_vm0, %v38_v24 }
  0x3f   :  { %321 = vmatpush.xpose.msk.msra.mxu2 %vm94_vm0, %v38_v24  ;;  %320 = vmatpush.xpose.msk.msra.mxu1 %vm94_vm0, %v38_v24 }
  0x41   :  { %271 = vmatmul.msk.f32.vlgmr.msra.gmra.mxu3 %vm94_vm0, %v25_v25  ;;  %266 = vmatmul.msk.f32.vlgmr.msra.gmra.mxu0 %vm94_vm0, %v20_v26 }
  0x42   :  { %270 = vmatmul.msk.f32.vlgmr.msra.gmra.mxu2 %vm94_vm0, %v24_v27  ;;  %268 = vmatmul.msk.f32.vlgmr.msra.gmra.mxu1 %vm94_vm0, %v22_v28 }
  0x49   :  { %272 = vmatmul.msk.f32.gmra.mxu3 %vm94_vm0, %v26_v30  ;;  %267 = vmatmul.msk.f32.gmra.mxu0 %vm94_vm0, %v21_v31 }
  0x4a   :  { %269 = vmatmul.msk.f32.gmra.mxu1 %vm94_vm0, %v23_v32 }
  0x51   :  { %273 = vmatmul.msk.f32.gmra.mxu3 %vm94_vm0, %v27_v33 }
  0x62   :  { %v72_v39 = vpop.permute.xlu2 %71 }
  0x6a   :  { %v67_v53 = vpop.permute.xlu2 %66 }
  0x72   :  { %v219_v3 = vpop.permute.xlu2 %218 }
  0x77   :  { %v92_v35 = vpop.permute.xlu0 %91 }
  0x7a   :  { %v82_v36 = vpop.permute.xlu1 %81 }
  0x7f   :  { %v87_v40 = vpop.permute.xlu0 %86 }
  0x82   :  { %v77_v42 = vpop.permute.xlu1 %76 }
  0x87   :  { %v62_v55 = vpop.permute.xlu0 %61 }
  0x8a   :  { %v57_v59 = vpop.permute.xlu1 %56 }
  0xbe   :  { %v184_v41 = vpop.f32.mrf.mxu0 }
  0xbf   :  { %v190_v38 = vpop.f32.mrf.mxu1  ;;  %v185_v63 = vadd.f32 %v184_v41, %v57_v59 }
  0xc0   :  { %v191_v57 = vadd.f32 %v190_v38, %v67_v53 }
  0xc1   :  { %v208_v1 = vmax.f32 %v185_v63, 0.0 }
  0xc2   :  { %v210_v62 = vmax.f32 %v191_v57, 0.0 }
  0xc4   :  { %v199_v34 = vpop.f32.mrf.mxu3 }
  0xc5   :  { %v196_v46 = vpop.f32.mrf.mxu2  ;;  %v200_v47 = vadd.f32 %v199_v34, %v82_v36 }
  0xc6   :  { %v197_v51 = vadd.f32 %v196_v46, %v77_v42  ;;  %v187_v56 = vpop.f32.mrf.mxu0 }
  0xc7   :  { %v193_v49 = vpop.f32.mrf.mxu1  ;;  %v213_v52 = vmax.f32 %v200_v47, 0.0  ;;  %v188_v60 = vadd.f32 %v187_v56, %v62_v55 }
  0xc8   :  { %v194_v54 = vadd.f32 %v193_v49, %v72_v39  ;;  %v212_v58 = vmax.f32 %v197_v51, 0.0 }
  0xc9   :  { %v209_v0 = vmax.f32 %v188_v60, 0.0 }
  0xca   :  { %v211_v61 = vmax.f32 %v194_v54, 0.0 }
  0xcc   :  { %v202_v37 = vpop.f32.mrf.mxu3 }
  0xcd   :  { %v203_v44 = vadd.f32 %v202_v37, %v87_v40 }
  0xcf   :  { %v214_v50 = vmax.f32 %v203_v44, 0.0 }
  0xd4   :  { %v205_v43 = vpop.f32.mrf.mxu3 }
  0xd5   :  { %v206_v45 = vadd.f32 %v205_v43, %v92_v35 }
  0xd7   :  { %v215_v48 = vmax.f32 %v206_v45, 0.0 }
  0xd9   :  { %233 = vmatpush.msrb.mxu1 %v215_v48 }
  0xdb   :  { %234 = vmatpush.msrb.mxu1 %v214_v50 }
  0xdd   :  { %235 = vmatpush.msrb.mxu1 %v213_v52 }
  0xdf   :  { %236 = vmatpush.msrb.mxu1 %v212_v58 }
  0xe1   :  { %237 = vmatpush.msrb.mxu1 %v211_v61 }
  0xe3   :  { %238 = vmatpush.msrb.mxu1 %v210_v62 }
  0xe5   :  { %239 = vmatpush.msrb.mxu1 %v209_v0 }
  0xe7   :  { %240 = vmatpush.msrb.mxu1 %v208_v1 }
  0xe8   :  { %274 = vmatmul.msk.f32.vlgmr.msrb.gmra.mxu1 %vm221_vm1, %v36_v2 }
 0x165   :  { %v242_v4 = vpop.f32.mrf.mxu1 }
 0x166   :  { %v243_v5 = vadd.f32 %v242_v4, %v219_v3 }
 0x168   :  { %245 = vst [vmem:[%s540_s5] sm:$0xf] %v243_v5 }

</bundles_post_ra>
